<compile_context>
chip_gen: v7x
topology: tpu7x:2x2x1
jax: 0.10.0
libtpu: 0.0.40
codegen_flags: <defaults>
</compile_context>

<pallas_src>
import functools

import jax
import jax.numpy as jnp
from jax.experimental import pallas as pl
from jax.experimental.pallas import tpu as pltpu

NEG_SLOPE = 0.01     # torch.nn.LeakyReLU default
SUBLANE = 8          # f32 sublane granularity
MAX_BM = 512         # batch-tile cap (review: 256-1024; 512 fits VMEM w/ margin)


def _round_up(n, m):
    return ((n + m - 1) // m) * m


def _leaky_relu(y):
    # max(y, a*y) == LeakyReLU(y) for 0 < a < 1 (2 VPU ops instead of 3).
    return jnp.maximum(y, NEG_SLOPE * y)


def _pick_act_dtype():
    """bf16 inter-layer activations only where the VPU has a bf16 path."""
    try:
        kind = jax.devices()[0].device_kind.lower()
    except Exception:
        return jnp.float32
    if ("v6" in kind) or ("v7" in kind) or ("tpu7" in kind):
        return jnp.bfloat16
    return jnp.float32   # v5e and older: no bf16 VPU -> keep f32 epilogue


def encdec_kernel(x_ref,
                  w1_ref, b1_ref, w2_ref, b2_ref,
                  w3_ref, b3_ref, w4_ref, b4_ref,
                  o_ref, *, act_dtype):
    """4-layer MLP (enc: P->s1->s2, dec: s2->s1->P) on one (bm, P) batch tile.

    Weights are bf16 MXU operands; matmuls accumulate in f32.  Inter-layer
    bias-add + LeakyReLU run in `act_dtype` (bf16 on v6e/v7x, f32 on v5e); the
    final layer's epilogue is f32 and produces the f32 output tile.
    """

    def lin(h, w_ref, b_ref, out_dtype):
        y = jnp.dot(h.astype(jnp.bfloat16), w_ref[...],
                    preferred_element_type=jnp.float32)
        y = y.astype(out_dtype) + b_ref[...].astype(out_dtype)
        return _leaky_relu(y)

    h = x_ref[...]
    h = lin(h, w1_ref, b1_ref, act_dtype)      # encode layer 0
    h = lin(h, w2_ref, b2_ref, act_dtype)      # encode layer 1
    h = lin(h, w3_ref, b3_ref, act_dtype)      # decode layer 0
    h = lin(h, w4_ref, b4_ref, jnp.float32)    # decode layer 1 (f32 epilogue)
    o_ref[...] = h.astype(o_ref.dtype)


def make_params(frame_size, key):
    """PyTorch-style Linear init U(-1/sqrt(fan_in), +1/sqrt(fan_in)), f32."""
    C, H, W = frame_size
    P = C * H * W
    sizes = [P, int(P ** 0.55), int(P ** 0.45)]
    # encode: P->s1, s1->s2 ; decode (reversed): s2->s1, s1->P
    layer_dims = [(sizes[0], sizes[1]), (sizes[1], sizes[2]),
                  (sizes[2], sizes[1]), (sizes[1], sizes[0])]
    params = []
    for fan_in, fan_out in layer_dims:
        key, kw, kb = jax.random.split(key, 3)
        bound = 1.0 / (fan_in ** 0.5)
        w = jax.random.uniform(kw, (fan_in, fan_out), jnp.float32, -bound, bound)
        b = jax.random.uniform(kb, (1, fan_out), jnp.float32, -bound, bound)
        params.append((w, b))
    return params, sizes


def prepare_params(params, pixel_channels):
    """bf16 weights (MXU operands), f32 biases.

    Hidden dims are zero-padded only to a multiple of 8 (sublane); lane padding
    to 128 happens for free inside VMEM, so HBM weight traffic stays ~3x lower
    than full 128-padding (matters in the DMA-bound small-batch regime).
    Padding is exact: padded output columns have zero weights and zero bias so
    LeakyReLU(0)=0, and the next layer's padded input rows are zero.
    """
    prepped = []
    for w, b in params:
        fi, fo = w.shape
        fip = fi if fi == pixel_channels else _round_up(fi, SUBLANE)
        fop = fo if fo == pixel_channels else _round_up(fo, SUBLANE)
        wp = jnp.zeros((fip, fop), jnp.bfloat16).at[:fi, :fo].set(
            w.astype(jnp.bfloat16))
        bp = jnp.zeros((1, fop), jnp.float32).at[:, :fo].set(b)
        prepped.append((wp, bp))
    return prepped


def encoder_decoder_forward(x_nchw, prepped_params, *, act_dtype=None):
    if act_dtype is None:
        act_dtype = _pick_act_dtype()
    N, C, H, W = x_nchw.shape
    P = C * H * W
    (w1, b1), (w2, b2), (w3, b3), (w4, b4) = prepped_params
    assert w1.shape[0] == P and w4.shape[1] == P, "params do not match frame_size"

    x_flat = x_nchw.reshape(N, P)            # == nn.Flatten(1); dtype passthrough

    # Batch tiling:
    #  * N < 256: one grid step, bm = round_up(N, 8) -> minimal padding, no
    #    dead grid steps, no duplicated weight DMA across megacore cores.
    #  * N >= 256: split so each TensorCore gets >=128 real rows, capped at
    #    MAX_BM rows per step (per-step overhead ~0.35us amortized).
    if N < 256:
        bm = _round_up(max(N, 1), SUBLANE)
    else:
        bm = min(MAX_BM, _round_up(pl.cdiv(N, 2), SUBLANE))
    n_tiles = pl.cdiv(N, bm)
    Np = n_tiles * bm
    if Np != N:                              # pad remainder rows; sliced off below
        x_flat = jnp.pad(x_flat, ((0, Np - N), (0, 0)))

    def fixed(arr):
        # Whole-array block with a constant index_map: Pallas DMAs it once and
        # reuses the same VMEM buffer on every grid step.
        return pl.BlockSpec(arr.shape, lambda i: (0, 0))

    flops = 2 * Np * sum(int(w.shape[0]) * int(w.shape[1])
                         for w, _ in prepped_params)
    bytes_accessed = (x_flat.size * x_flat.dtype.itemsize + Np * P * 4
                      + sum(w.size * 2 + b.size * 4 for w, b in prepped_params))

    # Only raise the scoped-VMEM limit when the big-tile path actually needs it
    # (v5e default is 16 MiB; v6e/v7x default 32 MiB already covers bm=512).
    vmem_limit = 48 * 1024 * 1024 if bm > 256 else None

    kernel = functools.partial(encdec_kernel, act_dtype=act_dtype)
    out_flat = pl.pallas_call(
        kernel,
        out_shape=jax.ShapeDtypeStruct((Np, P), jnp.float32),
        grid=(n_tiles,),
        in_specs=[
            pl.BlockSpec((bm, P), lambda i: (i, 0)),       # x batch tile
            fixed(w1), fixed(b1),
            fixed(w2), fixed(b2),
            fixed(w3), fixed(b3),
            fixed(w4), fixed(b4),
        ],
        out_specs=pl.BlockSpec((bm, P), lambda i: (i, 0)),
        compiler_params=pltpu.CompilerParams(
            dimension_semantics=("parallel",),
            vmem_limit_bytes=vmem_limit,
        ),
        cost_estimate=pl.CostEstimate(
            flops=flops, transcendentals=0, bytes_accessed=bytes_accessed),
    )(x_flat, w1, b1, w2, b2, w3, b3, w4, b4)

    return out_flat[:N].reshape(N, C, H, W)  # == nn.Unflatten(1, frame_size)


def reference_forward_f32(x_nchw, params):
    """Pure f32 reference == the PyTorch module's forward semantics."""
    N = x_nchw.shape[0]
    h = x_nchw.reshape(N, -1).astype(jnp.float32)
    for w, b in params:
        y = jnp.dot(h, w, precision=jax.lax.Precision.HIGHEST) + b
        h = jnp.where(y > 0, y, NEG_SLOPE * y)
    return h.reshape(x_nchw.shape)


def reference_forward_like_kernel(x_nchw, prepped, act_dtype):
    """Plain-JAX mirror of the kernel math: bf16 operands, f32 accumulation,
    act_dtype epilogue for intermediate layers, f32 epilogue for the last."""
    N = x_nchw.shape[0]
    h = x_nchw.reshape(N, -1)
    last = len(prepped) - 1
    for idx, (w, b) in enumerate(prepped):
        out_dtype = jnp.float32 if idx == last else act_dtype
        y = jnp.dot(h.astype(jnp.bfloat16), w, preferred_element_type=jnp.float32)
        y = y.astype(out_dtype) + b.astype(out_dtype)
        h = jnp.maximum(y, NEG_SLOPE * y)
    return h.astype(jnp.float32).reshape(x_nchw.shape)


if __name__ == "__main__":
    key = jax.random.PRNGKey(0)
    frame_size = (4, 16, 16)           # (C, H, W) -> pixel_channels = 1024
    pixel_channels = frame_size[0] * frame_size[1] * frame_size[2]

    key, kx, kx2, kp = jax.random.split(key, 4)
    params, sizes = make_params(frame_size, kp)        # sizes == [1024, 45, 22]
    prepped = prepare_params(params, pixel_channels)   # bf16, hidden dims -> 48/24
    act_dtype = _pick_act_dtype()

    # Small-batch / streaming case (batch=2): single grid step, 8-row tile.
    x = jax.random.normal(kx, (2,) + frame_size, dtype=jnp.float32)
    out = jax.block_until_ready(encoder_decoder_forward(x, prepped, act_dtype=act_dtype))
    assert out.shape == x.shape

    # Tight check vs. a reference doing the exact kernel math.
    ref_k = reference_forward_like_kernel(x, prepped, act_dtype)
    assert jnp.allclose(out, ref_k, atol=2e-3, rtol=2e-3), "mismatch vs kernel-math reference"
    # Loose check vs. the full-f32 (PyTorch-semantics) reference (bf16 weights).
    ref_f = reference_forward_f32(x, params)
    assert jnp.allclose(out, ref_f, atol=3e-2, rtol=3e-2), "mismatch vs f32 reference"

    # Larger batch: exercises the tiled "parallel" grid (2 steps / megacore
    # split) and the remainder-row padding + slice-off path.
    x_big = jax.random.normal(kx2, (300,) + frame_size, dtype=jnp.float32)
    out_big = jax.block_until_ready(
        encoder_decoder_forward(x_big, prepped, act_dtype=act_dtype))
    assert out_big.shape == x_big.shape
    ref_kb = reference_forward_like_kernel(x_big, prepped, act_dtype)
    assert jnp.allclose(out_big, ref_kb, atol=2e-3, rtol=2e-3), "mismatch (tiled path)"

    print("KERNEL_OK")
</pallas_src>

<mosaic_0001>
module attributes {stable_mosaic.version = 11 : i64} {
  func.func @encdec_kernel(%arg0: i32, %arg1: memref<8x1024xf32, #tpu.memory_space<vmem>>, %arg2: memref<1024x48xbf16, #tpu.memory_space<vmem>>, %arg3: memref<1x48xf32, #tpu.memory_space<vmem>>, %arg4: memref<48x24xbf16, #tpu.memory_space<vmem>>, %arg5: memref<1x24xf32, #tpu.memory_space<vmem>>, %arg6: memref<24x48xbf16, #tpu.memory_space<vmem>>, %arg7: memref<1x48xf32, #tpu.memory_space<vmem>>, %arg8: memref<48x1024xbf16, #tpu.memory_space<vmem>>, %arg9: memref<1x1024xf32, #tpu.memory_space<vmem>>, %arg10: memref<8x1024xf32, #tpu.memory_space<vmem>>) attributes {dimension_semantics = [#tpu.dimension_semantics<parallel>], iteration_bounds = array<i64: 1>, scalar_prefetch = 0 : i64, scratch_operands = 0 : i64, tpu.core_type = #tpu.core_type<tc>, window_params = [{transform_indices = @transform_0, window_bounds = array<i64: 8, 1024>}, {pipeline_mode = #tpu.pipeline_mode<synchronous>, transform_indices = @transform_1, window_bounds = array<i64: 1024, 48>}, {pipeline_mode = #tpu.pipeline_mode<synchronous>, transform_indices = @transform_2, window_bounds = array<i64: 1, 48>}, {pipeline_mode = #tpu.pipeline_mode<synchronous>, transform_indices = @transform_3, window_bounds = array<i64: 48, 24>}, {pipeline_mode = #tpu.pipeline_mode<synchronous>, transform_indices = @transform_4, window_bounds = array<i64: 1, 24>}, {pipeline_mode = #tpu.pipeline_mode<synchronous>, transform_indices = @transform_5, window_bounds = array<i64: 24, 48>}, {pipeline_mode = #tpu.pipeline_mode<synchronous>, transform_indices = @transform_6, window_bounds = array<i64: 1, 48>}, {pipeline_mode = #tpu.pipeline_mode<synchronous>, transform_indices = @transform_7, window_bounds = array<i64: 48, 1024>}, {pipeline_mode = #tpu.pipeline_mode<synchronous>, transform_indices = @transform_8, window_bounds = array<i64: 1, 1024>}, {transform_indices = @transform_9, window_bounds = array<i64: 8, 1024>}]} {
    %c0 = arith.constant 0 : index
    %c0_0 = arith.constant 0 : index
    %0 = vector.load %arg1[%c0, %c0_0] : memref<8x1024xf32, #tpu.memory_space<vmem>>, vector<8x1024xf32>
    %1 = arith.truncf %0 : vector<8x1024xf32> to vector<8x1024xbf16>
    %c0_1 = arith.constant 0 : index
    %c0_2 = arith.constant 0 : index
    %2 = vector.load %arg2[%c0_1, %c0_2] : memref<1024x48xbf16, #tpu.memory_space<vmem>>, vector<1024x48xbf16>
    %cst = arith.constant dense<0.000000e+00> : vector<8x48xf32>
    %3 = tpu.matmul %1, %2, %cst {dimension_numbers = #tpu.dot_dimension_numbers<[1], [0], [0], [1], [0, 0, 1, 1], [], []>} : vector<8x1024xbf16>, vector<1024x48xbf16>, vector<8x48xf32> -> vector<8x48xf32>
    %c0_3 = arith.constant 0 : index
    %c0_4 = arith.constant 0 : index
    %4 = vector.load %arg3[%c0_3, %c0_4] : memref<1x48xf32, #tpu.memory_space<vmem>>, vector<1x48xf32>
    %5 = vector.broadcast %4 : vector<1x48xf32> to vector<8x48xf32>
    %6 = arith.addf %3, %5 : vector<8x48xf32>
    %cst_5 = arith.constant 0.00999999977 : f32
    %7 = vector.broadcast %cst_5 : f32 to vector<8x48xf32>
    %8 = arith.mulf %7, %6 : vector<8x48xf32>
    %9 = arith.maximumf %6, %8 : vector<8x48xf32>
    %10 = arith.truncf %9 : vector<8x48xf32> to vector<8x48xbf16>
    %c0_6 = arith.constant 0 : index
    %c0_7 = arith.constant 0 : index
    %11 = vector.load %arg4[%c0_6, %c0_7] : memref<48x24xbf16, #tpu.memory_space<vmem>>, vector<48x24xbf16>
    %cst_8 = arith.constant dense<0.000000e+00> : vector<8x24xf32>
    %12 = tpu.matmul %10, %11, %cst_8 {dimension_numbers = #tpu.dot_dimension_numbers<[1], [0], [0], [1], [0, 0, 1, 1], [], []>} : vector<8x48xbf16>, vector<48x24xbf16>, vector<8x24xf32> -> vector<8x24xf32>
    %c0_9 = arith.constant 0 : index
    %c0_10 = arith.constant 0 : index
    %13 = vector.load %arg5[%c0_9, %c0_10] : memref<1x24xf32, #tpu.memory_space<vmem>>, vector<1x24xf32>
    %14 = vector.broadcast %13 : vector<1x24xf32> to vector<8x24xf32>
    %15 = arith.addf %12, %14 : vector<8x24xf32>
    %cst_11 = arith.constant 0.00999999977 : f32
    %16 = vector.broadcast %cst_11 : f32 to vector<8x24xf32>
    %17 = arith.mulf %16, %15 : vector<8x24xf32>
    %18 = arith.maximumf %15, %17 : vector<8x24xf32>
    %19 = arith.truncf %18 : vector<8x24xf32> to vector<8x24xbf16>
    %c0_12 = arith.constant 0 : index
    %c0_13 = arith.constant 0 : index
    %20 = vector.load %arg6[%c0_12, %c0_13] : memref<24x48xbf16, #tpu.memory_space<vmem>>, vector<24x48xbf16>
    %cst_14 = arith.constant dense<0.000000e+00> : vector<8x48xf32>
    %21 = tpu.matmul %19, %20, %cst_14 {dimension_numbers = #tpu.dot_dimension_numbers<[1], [0], [0], [1], [0, 0, 1, 1], [], []>} : vector<8x24xbf16>, vector<24x48xbf16>, vector<8x48xf32> -> vector<8x48xf32>
    %c0_15 = arith.constant 0 : index
    %c0_16 = arith.constant 0 : index
    %22 = vector.load %arg7[%c0_15, %c0_16] : memref<1x48xf32, #tpu.memory_space<vmem>>, vector<1x48xf32>
    %23 = vector.broadcast %22 : vector<1x48xf32> to vector<8x48xf32>
    %24 = arith.addf %21, %23 : vector<8x48xf32>
    %cst_17 = arith.constant 0.00999999977 : f32
    %25 = vector.broadcast %cst_17 : f32 to vector<8x48xf32>
    %26 = arith.mulf %25, %24 : vector<8x48xf32>
    %27 = arith.maximumf %24, %26 : vector<8x48xf32>
    %28 = arith.truncf %27 : vector<8x48xf32> to vector<8x48xbf16>
    %c0_18 = arith.constant 0 : index
    %c0_19 = arith.constant 0 : index
    %29 = vector.load %arg8[%c0_18, %c0_19] : memref<48x1024xbf16, #tpu.memory_space<vmem>>, vector<48x1024xbf16>
    %cst_20 = arith.constant dense<0.000000e+00> : vector<8x1024xf32>
    %30 = tpu.matmul %28, %29, %cst_20 {dimension_numbers = #tpu.dot_dimension_numbers<[1], [0], [0], [1], [0, 0, 1, 1], [], []>} : vector<8x48xbf16>, vector<48x1024xbf16>, vector<8x1024xf32> -> vector<8x1024xf32>
    %c0_21 = arith.constant 0 : index
    %c0_22 = arith.constant 0 : index
    %31 = vector.load %arg9[%c0_21, %c0_22] : memref<1x1024xf32, #tpu.memory_space<vmem>>, vector<1x1024xf32>
    %32 = vector.broadcast %31 : vector<1x1024xf32> to vector<8x1024xf32>
    %33 = arith.addf %30, %32 : vector<8x1024xf32>
    %cst_23 = arith.constant 0.00999999977 : f32
    %34 = vector.broadcast %cst_23 : f32 to vector<8x1024xf32>
    %35 = arith.mulf %34, %33 : vector<8x1024xf32>
    %36 = arith.maximumf %33, %35 : vector<8x1024xf32>
    %c0_24 = arith.constant 0 : index
    %c0_25 = arith.constant 0 : index
    %37 = vector.load %arg10[%c0_24, %c0_25] : memref<8x1024xf32, #tpu.memory_space<vmem>>, vector<8x1024xf32>
    tpu.vector_store %arg10[%c0_24, %c0_25], %36 {strides = array<i32>} : memref<8x1024xf32, #tpu.memory_space<vmem>>, vector<8x1024xf32>,
    return
  }
  func.func @transform_0(%arg0: i32) -> (i32, i32) {
    %c0_i32 = arith.constant 0 : i32
    %c0_i32_0 = arith.constant 0 : i32
    return %arg0, %c0_i32 : i32, i32
  }
  func.func @transform_1(%arg0: i32) -> (i32, i32) {
    %c0_i32 = arith.constant 0 : i32
    %c0_i32_0 = arith.constant 0 : i32
    %c0_i32_1 = arith.constant 0 : i32
    return %c0_i32, %c0_i32_0 : i32, i32
  }
  func.func @transform_2(%arg0: i32) -> (i32, i32) {
    %c0_i32 = arith.constant 0 : i32
    %c0_i32_0 = arith.constant 0 : i32
    %c0_i32_1 = arith.constant 0 : i32
    return %c0_i32, %c0_i32_0 : i32, i32
  }
  func.func @transform_3(%arg0: i32) -> (i32, i32) {
    %c0_i32 = arith.constant 0 : i32
    %c0_i32_0 = arith.constant 0 : i32
    %c0_i32_1 = arith.constant 0 : i32
    return %c0_i32, %c0_i32_0 : i32, i32
  }
  func.func @transform_4(%arg0: i32) -> (i32, i32) {
    %c0_i32 = arith.constant 0 : i32
    %c0_i32_0 = arith.constant 0 : i32
    %c0_i32_1 = arith.constant 0 : i32
    return %c0_i32, %c0_i32_0 : i32, i32
  }
  func.func @transform_5(%arg0: i32) -> (i32, i32) {
    %c0_i32 = arith.constant 0 : i32
    %c0_i32_0 = arith.constant 0 : i32
    %c0_i32_1 = arith.constant 0 : i32
    return %c0_i32, %c0_i32_0 : i32, i32
  }
  func.func @transform_6(%arg0: i32) -> (i32, i32) {
    %c0_i32 = arith.constant 0 : i32
    %c0_i32_0 = arith.constant 0 : i32
    %c0_i32_1 = arith.constant 0 : i32
    return %c0_i32, %c0_i32_0 : i32, i32
  }
  func.func @transform_7(%arg0: i32) -> (i32, i32) {
    %c0_i32 = arith.constant 0 : i32
    %c0_i32_0 = arith.constant 0 : i32
    %c0_i32_1 = arith.constant 0 : i32
    return %c0_i32, %c0_i32_0 : i32, i32
  }
  func.func @transform_8(%arg0: i32) -> (i32, i32) {
    %c0_i32 = arith.constant 0 : i32
    %c0_i32_0 = arith.constant 0 : i32
    %c0_i32_1 = arith.constant 0 : i32
    return %c0_i32, %c0_i32_0 : i32, i32
  }
  func.func @transform_9(%arg0: i32) -> (i32, i32) {
    %c0_i32 = arith.constant 0 : i32
    %c0_i32_0 = arith.constant 0 : i32
    return %arg0, %c0_i32 : i32, i32
  }
}

</mosaic_0001>

<bundles_post_ra>
// kernel: tpu_custom_call.1
= control target key start
LH: loop header
LB: loop body
LE: loop exit
PB: predicated region body
PF: predicated region fallthrough
CT: control target
= control target key end

     0   :  { %s1969_s0 = inlined_call_operand.vmem [shape: f32[8,1024], index: 0, kind: input, shape index: {}]   ;;  %s1970_s1 = inlined_call_operand.vmem [shape: bf16[1024,48], index: 1, kind: input, shape index: {}]   ;;  %s1971_s2 = inlined_call_operand.vmem [shape: f32[1,48], index: 2, kind: input, shape index: {}]   ;;  %s1972_s3 = inlined_call_operand.vmem [shape: bf16[48,24], index: 3, kind: input, shape index: {}]   ;;  %s1973_s4 = inlined_call_operand.vmem [shape: f32[1,24], index: 4, kind: input, shape index: {}]   ;;  %s1974_s5 = inlined_call_operand.vmem [shape: bf16[24,48], index: 5, kind: input, shape index: {}]   ;;  %s1975_s6 = inlined_call_operand.vmem [shape: f32[1,48], index: 6, kind: input, shape index: {}]   ;;  %s1976_s7 = inlined_call_operand.vmem [shape: bf16[48,1024], index: 7, kind: input, shape index: {}]   ;;  %s1977_s8 = inlined_call_operand.vmem [shape: f32[1,1024], index: 8, kind: input, shape index: {}]   ;;  %s1978_s9 = inlined_call_operand.hbm [shape: f32[8,1024], index: 9, kind: output, shape index: {}]  }
   0x1   :  { %v1490_v0 = vld [vmem:[%s1970_s1 + $0x40] sm:$0xff]   ;;  %v1494_v4 = vld [vmem:[%s1970_s1 + $0x48] sm:$0xff]   ;;  %v1498_v8 = vld [vmem:[%s1970_s1 + $0x50] sm:$0xff]  }
   0x2   :  { %v1491_v1 = vld [vmem:[%s1970_s1 + $0xc0] sm:$0xff]   ;;  %1373 = vmatprep.subr.bf16.mxu0 %v1490_v0  ;;  %v1495_v5 = vld [vmem:[%s1970_s1 + $0xc8] sm:$0xff]   ;;  %v1499_v9 = vld [vmem:[%s1970_s1 + $0xd0] sm:$0xff]  }
   0x3   :  { %v1492_v2 = vld [vmem:[%s1970_s1] sm:$0xff]   ;;  %1395 = vmatprep.subr.bf16.mxu1 %v1491_v1  ;;  %v1496_v6 = vld [vmem:[%s1970_s1 + $0x8] sm:$0xff]   ;;  %v1500_v10 = vld [vmem:[%s1970_s1 + $0x10] sm:$0xff]  }
   0x4   :  { %v1493_v3 = vld [vmem:[%s1970_s1 + $0x80] sm:$0xff]   ;;  %1374 = vmatpush3.bf16.msra.mxu0 %v1492_v2  ;;  %v1497_v7 = vld [vmem:[%s1970_s1 + $0x88] sm:$0xff]   ;;  %v1501_v11 = vld [vmem:[%s1970_s1 + $0x90] sm:$0xff]  }
   0x5   :  { %1396 = vmatpush3.bf16.msra.mxu1 %v1493_v3  ;;  %1375 = vmatprep.subr.bf16.mxu0 %v1494_v4  ;;  %v1502_v12 = vld [vmem:[%s1970_s1 + $0x58] sm:$0xff]   ;;  %v1506_v16 = vld [vmem:[%s1970_s1 + $0x60] sm:$0xff]   ;;  %v1510_v20 = vld [vmem:[%s1970_s1 + $0x68] sm:$0xff]  }
   0x6   :  { %1397 = vmatprep.subr.bf16.mxu1 %v1495_v5  ;;  %v1503_v13 = vld [vmem:[%s1970_s1 + $0xd8] sm:$0xff]   ;;  %v1507_v17 = vld [vmem:[%s1970_s1 + $0xe0] sm:$0xff]   ;;  %v1511_v21 = vld [vmem:[%s1970_s1 + $0xe8] sm:$0xff]  }
   0x7   :  { %v1504_v14 = vld [vmem:[%s1970_s1 + $0x18] sm:$0xff]   ;;  %v1508_v18 = vld [vmem:[%s1970_s1 + $0x20] sm:$0xff]   ;;  %v1512_v22 = vld [vmem:[%s1970_s1 + $0x28] sm:$0xff]  }
   0x8   :  { %1376 = vmatpush3.bf16.msra.mxu0 %v1496_v6  ;;  %v1505_v15 = vld [vmem:[%s1970_s1 + $0x98] sm:$0xff]   ;;  %v1509_v19 = vld [vmem:[%s1970_s1 + $0xa0] sm:$0xff]   ;;  %v1513_v23 = vld [vmem:[%s1970_s1 + $0xa8] sm:$0xff]  }
   0x9   :  { %1398 = vmatpush3.bf16.msra.mxu1 %v1497_v7  ;;  %1377 = vmatprep.subr.bf16.mxu0 %v1498_v8  ;;  %v1514_v24 = vld [vmem:[%s1970_s1 + $0x70] sm:$0xff]   ;;  %v1518_v28 = vld [vmem:[%s1970_s1 + $0x78] sm:$0xff]   ;;  %v35_v32 = vld [vmem:[%s1969_s0 + $0x8] sm:$0xff] }
   0xa   :  { %1399 = vmatprep.subr.bf16.mxu1 %v1499_v9  ;;  %v1515_v25 = vld [vmem:[%s1970_s1 + $0xf0] sm:$0xff]   ;;  %v1519_v29 = vld [vmem:[%s1970_s1 + $0xf8] sm:$0xff]   ;;  %v34_v34 = vld [vmem:[%s1969_s0] sm:$0xff]  ;;  %v43_v35 = vpack.c.bf16 %v35_v32, %v35_v32 }
   0xb   :  { %v1516_v26 = vld [vmem:[%s1970_s1 + $0x30] sm:$0xff]   ;;  %v1520_v30 = vld [vmem:[%s1970_s1 + $0x38] sm:$0xff]   ;;  %v42_v37 = vpack.c.bf16 %v34_v34, %v34_v34  ;;  %v1522_v40 = vld [vmem:[%s1970_s1 + $0x140] sm:$0xff]  }
   0xc   :  { %1378 = vmatpush3.bf16.msra.mxu0 %v1500_v10  ;;  %v1517_v27 = vld [vmem:[%s1970_s1 + $0xb0] sm:$0xff]   ;;  %v1521_v31 = vld [vmem:[%s1970_s1 + $0xb8] sm:$0xff]   ;;  %601 = vmatprep.mubr.bf16.mxu0 %v43_v35  ;;  %v1523_v41 = vld [vmem:[%s1970_s1 + $0x1c0] sm:$0xff]  }
   0xd   :  { %1400 = vmatpush3.bf16.msra.mxu1 %v1501_v11  ;;  %1379 = vmatprep.subr.bf16.mxu0 %v1502_v12  ;;  %v37_v33 = vld [vmem:[%s1969_s0 + $0x18] sm:$0xff]  ;;  %v36_v38 = vld [vmem:[%s1969_s0 + $0x10] sm:$0xff]  ;;  %v1524_v42 = vld [vmem:[%s1970_s1 + $0x100] sm:$0xff]  }
   0xe   :  { %1401 = vmatprep.subr.bf16.mxu1 %v1503_v13  ;;  %v45_v36 = vpack.c.bf16 %v37_v33, %v37_v33  ;;  %v44_v39 = vpack.c.bf16 %v36_v38, %v36_v38  ;;  %v1525_v43 = vld [vmem:[%s1970_s1 + $0x180] sm:$0xff]   ;;  %v1526_v44 = vld [vmem:[%s1970_s1 + $0x148] sm:$0xff]   ;;  %v1530_v48 = vld [vmem:[%s1970_s1 + $0x150] sm:$0xff]  }
   0xf   :  { %v1527_v45 = vld [vmem:[%s1970_s1 + $0x1c8] sm:$0xff]   ;;  %v1531_v49 = vld [vmem:[%s1970_s1 + $0x1d0] sm:$0xff]   ;;  %v1534_v52 = vld [vmem:[%s1970_s1 + $0x158] sm:$0xff]  }
  0x10   :  { %1380 = vmatpush3.bf16.msra.mxu0 %v1504_v14  ;;  %641 = vmatprep.mubr.bf16.mxu1 %v45_v36  ;;  %v1528_v46 = vld [vmem:[%s1970_s1 + $0x108] sm:$0xff]   ;;  %v1532_v50 = vld [vmem:[%s1970_s1 + $0x110] sm:$0xff]   ;;  %v1535_v53 = vld [vmem:[%s1970_s1 + $0x1d8] sm:$0xff]  }
  0x11   :  { %1402 = vmatpush3.bf16.msra.mxu1 %v1505_v15  ;;  %1381 = vmatprep.subr.bf16.mxu0 %v1506_v16  ;;  %v1529_v47 = vld [vmem:[%s1970_s1 + $0x188] sm:$0xff]   ;;  %v1533_v51 = vld [vmem:[%s1970_s1 + $0x190] sm:$0xff]   ;;  %v1536_v54 = vld [vmem:[%s1970_s1 + $0x118] sm:$0xff]  }
  0x12   :  { %1403 = vmatprep.subr.bf16.mxu1 %v1507_v17  ;;  %v1537_v55 = vld [vmem:[%s1970_s1 + $0x198] sm:$0xff]   ;;  %v1538_v56 = vld [vmem:[%s1970_s1 + $0x160] sm:$0xff]   ;;  %v1542_v60 = vld [vmem:[%s1970_s1 + $0x168] sm:$0xff]  }
  0x13   :  { %v1539_v57 = vld [vmem:[%s1970_s1 + $0x1e0] sm:$0xff]   ;;  %v1543_v61 = vld [vmem:[%s1970_s1 + $0x1e8] sm:$0xff]   ;;  %v1546_v0 = vld [vmem:[%s1970_s1 + $0x170] sm:$0xff]  }
  0x14   :  { %1382 = vmatpush3.bf16.msra.mxu0 %v1508_v18  ;;  %v1540_v58 = vld [vmem:[%s1970_s1 + $0x120] sm:$0xff]   ;;  %v1544_v62 = vld [vmem:[%s1970_s1 + $0x128] sm:$0xff]   ;;  %v1547_v1 = vld [vmem:[%s1970_s1 + $0x1f0] sm:$0xff]  }
  0x15   :  { %1404 = vmatpush3.bf16.msra.mxu1 %v1509_v19  ;;  %1383 = vmatprep.subr.bf16.mxu0 %v1510_v20  ;;  %v1541_v59 = vld [vmem:[%s1970_s1 + $0x1a0] sm:$0xff]   ;;  %v1545_v63 = vld [vmem:[%s1970_s1 + $0x1a8] sm:$0xff]   ;;  %v1548_v2 = vld [vmem:[%s1970_s1 + $0x130] sm:$0xff]  }
  0x16   :  { %1405 = vmatprep.subr.bf16.mxu1 %v1511_v21  ;;  %v1549_v3 = vld [vmem:[%s1970_s1 + $0x1b0] sm:$0xff]   ;;  %v1550_v4 = vld [vmem:[%s1970_s1 + $0x178] sm:$0xff]   ;;  %v39_v8 = vld [vmem:[%s1969_s0 + $0x28] sm:$0xff] }
  0x17   :  { %v1551_v5 = vld [vmem:[%s1970_s1 + $0x1f8] sm:$0xff]   ;;  %v47_v10 = vpack.c.bf16 %v39_v8, %v39_v8  ;;  %v38_v12 = vld [vmem:[%s1969_s0 + $0x20] sm:$0xff]  ;;  %v40_v13 = vld [vmem:[%s1969_s0 + $0x30] sm:$0xff] }
  0x18   :  { %1384 = vmatpush3.bf16.msra.mxu0 %v1512_v22  ;;  %v1552_v6 = vld [vmem:[%s1970_s1 + $0x138] sm:$0xff]   ;;  %v46_v14 = vpack.c.bf16 %v38_v12, %v38_v12  ;;  %v48_v15 = vpack.c.bf16 %v40_v13, %v40_v13 }
  0x19   :  { %1406 = vmatpush3.bf16.msra.mxu1 %v1513_v23  ;;  %1385 = vmatprep.subr.bf16.mxu0 %v1514_v24  ;;  %v1553_v7 = vld [vmem:[%s1970_s1 + $0x1b8] sm:$0xff]  }
  0x1a   :  { %1407 = vmatprep.subr.bf16.mxu1 %v1515_v25  ;;  %v41_v9 = vld [vmem:[%s1969_s0 + $0x38] sm:$0xff] }
  0x1b   :  { %v49_v11 = vpack.c.bf16 %v41_v9, %v41_v9 }
  0x1c   :  { %1386 = vmatpush3.bf16.msra.mxu0 %v1516_v26 }
  0x1d   :  { %1408 = vmatpush3.bf16.msra.mxu1 %v1517_v27  ;;  %1387 = vmatprep.subr.bf16.mxu0 %v1518_v28 }
  0x1e   :  { %1409 = vmatprep.subr.bf16.mxu1 %v1519_v29 }
  0x20   :  { %1388 = vmatpush3.bf16.msra.mxu0 %v1520_v30 }
  0x21   :  { %1410 = vmatpush3.bf16.msra.mxu1 %v1521_v31  ;;  %1417 = vmatprep.subr.bf16.mxu0 %v1522_v40 }
  0x22   :  { %1439 = vmatprep.subr.bf16.mxu1 %v1523_v41 }
  0x23   :  { %602 = vmatmul.mubr.bf16.vlgmr.msra.gmra.mrb[0].mxu0 %v42_v37 }
  0x24   :  { %642 = vmatmul.mubr.bf16.vlgmr.msra.gmra.mrb[0].mxu1 %v44_v39  ;;  %1418 = vmatpush3.bf16.msra.mxu0 %v1524_v42 }
  0x25   :  { %1440 = vmatpush3.bf16.msra.mxu1 %v1525_v43  ;;  %1419 = vmatprep.subr.bf16.mxu0 %v1526_v44 }
  0x26   :  { %1441 = vmatprep.subr.bf16.mxu1 %v1527_v45  ;;  %681 = vmatprep.mubr.bf16.mxu0 %v47_v10 }
  0x27   :  { %721 = vmatprep.mubr.bf16.mxu1 %v49_v11 }
  0x28   :  { %1420 = vmatpush3.bf16.msra.mxu0 %v1528_v46 }
  0x29   :  { %1442 = vmatpush3.bf16.msra.mxu1 %v1529_v47  ;;  %1421 = vmatprep.subr.bf16.mxu0 %v1530_v48 }
  0x2a   :  { %1443 = vmatprep.subr.bf16.mxu1 %v1531_v49 }
  0x2c   :  { %1422 = vmatpush3.bf16.msra.mxu0 %v1532_v50 }
  0x2d   :  { %1444 = vmatpush3.bf16.msra.mxu1 %v1533_v51  ;;  %1423 = vmatprep.subr.bf16.mxu0 %v1534_v52 }
  0x2e   :  { %1445 = vmatprep.subr.bf16.mxu1 %v1535_v53 }
  0x30   :  { %1424 = vmatpush3.bf16.msra.mxu0 %v1536_v54 }
  0x31   :  { %1446 = vmatpush3.bf16.msra.mxu1 %v1537_v55  ;;  %1425 = vmatprep.subr.bf16.mxu0 %v1538_v56 }
  0x32   :  { %1447 = vmatprep.subr.bf16.mxu1 %v1539_v57 }
  0x34   :  { %1426 = vmatpush3.bf16.msra.mxu0 %v1540_v58 }
  0x35   :  { %1448 = vmatpush3.bf16.msra.mxu1 %v1541_v59  ;;  %1427 = vmatprep.subr.bf16.mxu0 %v1542_v60 }
  0x36   :  { %1449 = vmatprep.subr.bf16.mxu1 %v1543_v61 }
  0x38   :  { %1428 = vmatpush3.bf16.msra.mxu0 %v1544_v62 }
  0x39   :  { %1450 = vmatpush3.bf16.msra.mxu1 %v1545_v63  ;;  %1429 = vmatprep.subr.bf16.mxu0 %v1546_v0 }
  0x3a   :  { %1451 = vmatprep.subr.bf16.mxu1 %v1547_v1 }
  0x3c   :  { %1430 = vmatpush3.bf16.msra.mxu0 %v1548_v2 }
  0x3d   :  { %1452 = vmatpush3.bf16.msra.mxu1 %v1549_v3  ;;  %1431 = vmatprep.subr.bf16.mxu0 %v1550_v4 }
  0x3e   :  { %1453 = vmatprep.subr.bf16.mxu1 %v1551_v5 }
  0x40   :  { %1432 = vmatpush3.bf16.msra.mxu0 %v1552_v6 }
  0x41   :  { %1454 = vmatpush3.bf16.msra.mxu1 %v1553_v7 }
  0x43   :  { %682 = vmatmul.mubr.bf16.vlgmr.msra.gmra.mrb[4].mxu0 %v46_v14 }
  0x44   :  { %14 = vsyncpa [#allocation3], 0  ;;  %722 = vmatmul.mubr.bf16.vlgmr.msra.gmra.mrb[4].mxu1 %v48_v15  ;;  %v1554_v16 = vld [vmem:[%s1972_s3] sm:$0xff]   ;;  %v1583_v17 = vmov 0.0   ;;  %v1555_v18 = vld [vmem:[%s1972_s3 + $0x8] sm:$0xff]   ;;  %vm1584_vm0 = vmmov 0  }
  0x45   :  { %1468 = vmatprep.subr.bf16.mxu0 %v1583_v17  ;;  %1478 = vmatprep.subr.bf16.mxu1 %v1583_v17  ;;  %v1556_v19 = vld [vmem:[%s1972_s3 + $0x10] sm:$0xff]   ;;  %v1271_v22 = vld [vmem:[%s1971_s2] ss:$0 sm:$0xff]  ;;  %vm763_vm1 = vcmask 392192   ;;  %v1558_v49 = vld [vmem:[%s1974_s5 + $0x8] ss:$0 sps:$4 sm:$0xff]  }
  0x46   :  { %1469 = vmatpush3.bf16.msra.mxu0 %v1554_v16  ;;  %1474 = vmatprep.mubr.msk.bf16.mxu0 %vm1584_vm0, %v1583_v17  ;;  %v1557_v48 = vld [vmem:[%s1974_s5] sm:$0xff]   ;;  %vm833_vm2 = vcmask 1043456   ;;  %v881_v53 = vld [vmem:[%s1976_s7 + $0x8] sm:$0xff]  ;;  %vm829_vm3 = vcmask 195584  }
  0x47   :  { %1470 = vmatprep.subr.bf16.mxu0 %v1583_v17  ;;  %1482 = vmatprep.mubr.msk.bf16.mxu1 %vm1584_vm0, %v1583_v17  ;;  %v835_v50 = vsel %vm833_vm2, %v1558_v49, 0  ;;  %v880_v51 = vld [vmem:[%s1976_s7] sm:$0xff]  ;;  %v885_v56 = vld [vmem:[%s1976_s7 + $0x28] sm:$0xff] }
  0x48   :  { %1479 = vmatpush3.bf16.msra.mxu1 %v1557_v48  ;;  %v884_v52 = vld [vmem:[%s1976_s7 + $0x20] sm:$0xff]  ;;  %v1347_v57 = vcombine.low %v881_v53, %v885_v56  ;;  %v1348_v58 = vcombine.high %v881_v53, %v885_v56  ;;  %v889_v6 = vld [vmem:[%s1976_s7 + $0x48] sm:$0xff] }
  0x49   :  { %1480 = vmatprep.subr.bf16.mxu1 %v1583_v17  ;;  %v1345_v54 = vcombine.low %v880_v51, %v884_v52  ;;  %v1346_v55 = vcombine.high %v880_v51, %v884_v52  ;;  %v1336_v59 = vld [vmem:[%s1973_s4] ss:$0 sm:$0xff]  ;;  %v893_v8 = vld [vmem:[%s1976_s7 + $0x68] sm:$0xff] }
  0x4a   :  { %1471 = vmatpush3.bf16.msra.mxu0 %v1555_v18  ;;  %v888_v4 = vld [vmem:[%s1976_s7 + $0x40] sm:$0xff]  ;;  %v1355_v10 = vcombine.low %v889_v6, %v893_v8  ;;  %v1356_v11 = vcombine.high %v889_v6, %v893_v8  ;;  %v897_v14 = vld [vmem:[%s1976_s7 + $0x88] sm:$0xff] }
  0x4b   :  { %1472 = vmatprep.subr.bf16.mxu0 %v1583_v17  ;;  %v892_v5 = vld [vmem:[%s1976_s7 + $0x60] sm:$0xff]  ;;  %v901_v16 = vld [vmem:[%s1976_s7 + $0xa8] sm:$0xff] }
  0x4c   :  { %1481 = vmatpush3.bf16.msra.mxu1 %v835_v50  ;;  %v1354_v7 = vcombine.high %v888_v4, %v892_v5  ;;  %v1353_v9 = vcombine.low %v888_v4, %v892_v5  ;;  %v896_v12 = vld [vmem:[%s1976_s7 + $0x80] sm:$0xff]  ;;  %v1363_v18 = vcombine.low %v897_v14, %v901_v16 }
  0x4d   :  { %1069 = vmatprep.subr.bf16.mxu1 %v1346_v55  ;;  %v900_v13 = vld [vmem:[%s1976_s7 + $0xa0] sm:$0xff] }
  0x4e   :  { %1473 = vmatpush3.bf16.msra.mxu0 %v1556_v19  ;;  %v1362_v15 = vcombine.high %v896_v12, %v900_v13  ;;  %v1361_v17 = vcombine.low %v896_v12, %v900_v13  ;;  %v1364_v19 = vcombine.high %v897_v14, %v901_v16 }
  0x4f   :  { %1110 = vmatprep.subr.bf16.mxu0 %v1348_v58  ;;  %v904_v58 = vld [vmem:[%s1977_s8] sm:$0xff]  ;;  %s1586_s8 = smov [#allocation2]  }
  0x50   :  { %s1263_s12 = sshll.u32 %s1586_s8, 4  ;;  %s1264_s12 = int_to_ptr.vmem [resolvable:$true] %s1263_s12 }
  0x51   :  { %s1559_s13 = scalar_lea.vmem %s1264_s12, 1024  ;;  %p1564_p1 = scmp.lt.s32.totalorder %s1264_s12, %s1264_s12 }
  0x52   :  { %p1560_p0 = scmp.ne.s32.totalorder %s1264_s12, %s1559_s13  ;;  %p1565_p2 = scmp.lt.s32.totalorder %s1559_s13, %s1559_s13 }
  0x54   :  { %p1566_p3 = por %p1565_p2, %p1564_p1 }
  0x56   :  { %p1567_p4 = pnand %p1566_p3, %p1560_p0 }
  0xf6   :  { %v1389_v20 = vpop.f32.mrb[0].mxu0 }
  0xf7   :  { %v1411_v21 = vpop.f32.mrb[0].mxu1  ;;  %v1390_v23 = vpop.f32.mrb[1].mxu0 }
  0xf8   :  { %v1412_v24 = vpop.f32.mrb[1].mxu1  ;;  %v1391_v25 = vadd.f32 %v1390_v23, %v1389_v20  ;;  %v1392_v27 = vpop.f32.mrb[2].mxu0  ;;  %v882_v20 = vld [vmem:[%s1976_s7 + $0x10] sm:$0xff] }
  0xf9   :  { %v1413_v26 = vadd.f32 %v1412_v24, %v1411_v21  ;;  %v1414_v28 = vpop.f32.mrb[2].mxu1  ;;  %v1393_v29 = vpop.f32.mrb[3].mxu0  ;;  %v886_v21 = vld [vmem:[%s1976_s7 + $0x30] sm:$0xff] }
  0xfa   :  { %v1415_v30 = vpop.f32.mrb[3].mxu1  ;;  %v604_v31 = vadd.f32 %v1391_v25, %v1271_v22  ;;  %v883_v22 = vld [vmem:[%s1976_s7 + $0x18] sm:$0xff]  ;;  %v1349_v23 = vcombine.low %v882_v20, %v886_v21  ;;  %v1350_v24 = vcombine.high %v882_v20, %v886_v21  ;;  %v1341_v29 = vld [vmem:[%s1975_s6] ss:$0 sm:$0xff] }
  0xfb   :  { %v887_v25 = vld [vmem:[%s1976_s7 + $0x38] sm:$0xff] }
  0xfc   :  { %v644_v32 = vadd.f32 %v1413_v26, %v604_v31  ;;  %v1585_v26 = vmov 0   ;;  %v1351_v27 = vcombine.low %v883_v22, %v887_v25  ;;  %v1352_v28 = vcombine.high %v883_v22, %v887_v25 }
 0x116   :  { %v1433_v33 = vpop.f32.mrb[4].mxu0 }
 0x117   :  { %v1455_v34 = vpop.f32.mrb[4].mxu1  ;;  %v1434_v35 = vpop.f32.mrb[5].mxu0 }
 0x118   :  { %v1435_v36 = vadd.f32 %v1434_v35, %v1433_v33  ;;  %v1456_v37 = vpop.f32.mrb[5].mxu1  ;;  %v1436_v38 = vpop.f32.mrb[6].mxu0 }
 0x119   :  { %v1457_v39 = vadd.f32 %v1456_v37, %v1455_v34  ;;  %v1458_v40 = vpop.f32.mrb[6].mxu1  ;;  %v1437_v41 = vpop.f32.mrb[7].mxu0  ;;  %v894_v37 = vld [vmem:[%s1976_s7 + $0x70] sm:$0xff]  ;;  %v891_v38 = vld [vmem:[%s1976_s7 + $0x58] sm:$0xff] }
 0x11a   :  { %v684_v42 = vadd.f32 %v1435_v36, %v644_v32  ;;  %v1459_v43 = vpop.f32.mrb[7].mxu1  ;;  %v890_v36 = vld [vmem:[%s1976_s7 + $0x50] sm:$0xff] }
 0x11b   :  { %v1357_v48 = vcombine.low %v890_v36, %v894_v37 }
 0x11c   :  { %v724_v44 = vadd.f32 %v1457_v39, %v684_v42  ;;  %v895_v39 = vld [vmem:[%s1976_s7 + $0x78] sm:$0xff]  ;;  %v1358_v42 = vcombine.high %v890_v36, %v894_v37 }
 0x11d   :  { %v1360_v43 = vcombine.high %v891_v38, %v895_v39  ;;  %v1359_v49 = vcombine.low %v891_v38, %v895_v39 }
 0x11e   :  { %v729_v45 = vmul.f32 0.01, %v724_v44 }
 0x120   :  { %v730_v46 = vmax.f32 %v724_v44, %v729_v45  ;;  %v898_v44 = vld [vmem:[%s1976_s7 + $0x90] sm:$0xff] }
 0x121   :  { %v902_v45 = vld [vmem:[%s1976_s7 + $0xb0] sm:$0xff] }
 0x122   :  { %v731_v47 = vpack.c.bf16 %v730_v46, %v730_v46  ;;  %v899_v46 = vld [vmem:[%s1976_s7 + $0x98] sm:$0xff]  ;;  %v1366_v50 = vcombine.high %v898_v44, %v902_v45  ;;  %v1365_v52 = vcombine.low %v898_v44, %v902_v45 }
 0x124   :  { %1475 = vmatmul.mubr.msk.bf16.vlgmr.msra.gmra.mrb[8].mxu0 %vm763_vm1, %v731_v47  ;;  %v903_v47 = vld [vmem:[%s1976_s7 + $0xb8] sm:$0xff] }
 0x125   :  { %1111 = vmatpush1.bf16.msra.mxu0 %v1347_v57  ;;  %1142 = vmatprep.mubr.bf16.mxu0 %v1585_v26  ;;  %v1368_v51 = vcombine.high %v899_v46, %v903_v47  ;;  %v1367_v53 = vcombine.low %v899_v46, %v903_v47 }
 0x126   :  { %1112 = vmatprep.subr.bf16.mxu0 %v1356_v11 }
 0x129   :  { %1113 = vmatpush1.bf16.msra.mxu0 %v1355_v10 }
 0x12a   :  { %1114 = vmatprep.subr.bf16.mxu0 %v1364_v19 }
 0x12d   :  { %1115 = vmatpush1.bf16.msra.mxu0 %v1363_v18 }
 0x12e   :  { %1192 = vmatprep.subr.bf16.mxu0 %v1352_v28 }
 0x1f7   :  { %v801_v60 = vpop.f32.mrb[8].mxu0 }
 0x1f8   :  { %v802_v61 = vadd.f32 %v1336_v59, %v801_v60  ;;  %v1476_v62 = vpop.f32.mrb[9].mxu0 }
 0x1f9   :  { %v804_v63 = vpop.f32.mrb[10].mxu0 }
 0x1fa   :  { %v807_v0 = vmul.f32 0.01, %v802_v61  ;;  %v1477_v1 = vpop.f32.mrb[11].mxu0 }
 0x1fc   :  { %v808_v2 = vmax.f32 %v802_v61, %v807_v0 }
 0x1fe   :  { %v809_v3 = vpack.c.bf16 %v808_v2, %v808_v2 }
 0x200   :  { %1483 = vmatmul.mubr.msk.bf16.vlgmr.msra.gmra.mrb[8].mxu1 %vm829_vm3, %v809_v3 }
 0x201   :  { %1070 = vmatpush1.bf16.msra.mxu1 %v1345_v54  ;;  %1101 = vmatprep.mubr.bf16.mxu1 %v1585_v26  ;;  %v906_v54 = vlaneseq }
 0x202   :  { %1071 = vmatprep.subr.bf16.mxu1 %v1354_v7 }
 0x203   :  { %v907_v55 = vshrl.u32 %v906_v54, 7 }
 0x205   :  { %1072 = vmatpush1.bf16.msra.mxu1 %v1353_v9  ;;  %v908_v56 = vsub.s32 0, %v907_v55  ;;  %v916_v57 = vsub.s32 2, %v907_v55  ;;  %v912_v59 = vsub.s32 1, %v907_v55  ;;  %v920_v60 = vsub.s32 3, %v907_v55 }
 0x206   :  { %1073 = vmatprep.subr.bf16.mxu1 %v1362_v15  ;;  %v924_v19 = vsub.s32 4, %v907_v55  ;;  %v932_v20 = vsub.s32 6, %v907_v55 }
 0x207   :  { %v909_v61 = vrot.slane %v904_v58, %v908_v56  ;;  %v917_v62 = vrot.slane %v904_v58, %v916_v57  ;;  %v913_v63 = vrot.slane %v904_v58, %v912_v59  ;;  %v921_v0 = vrot.slane %v904_v58, %v920_v60 }
 0x208   :  { %v925_v25 = vrot.slane %v904_v58, %v924_v19 }
 0x209   :  { %1074 = vmatpush1.bf16.msra.mxu1 %v1361_v17 }
 0x20a   :  { %1151 = vmatprep.subr.bf16.mxu1 %v1350_v24  ;;  %v936_v24 = vsub.s32 7, %v907_v55 }
 0x20c   :  { %v937_v28 = vrot.slane %v904_v58, %v936_v24 }
 0x2d3   :  { %v871_v30 = vpop.f32.mrb[8].mxu1 }
 0x2d4   :  { %v872_v31 = vadd.f32 %v1341_v29, %v871_v30  ;;  %v1484_v32 = vpop.f32.mrb[9].mxu1 }
 0x2d5   :  { %v874_v33 = vpop.f32.mrb[10].mxu1 }
 0x2d6   :  { %v877_v34 = vmul.f32 0.01, %v872_v31  ;;  %v1485_v35 = vpop.f32.mrb[11].mxu1 }
 0x2d8   :  { %v878_v40 = vmax.f32 %v872_v31, %v877_v34 }
 0x2da   :  { %v879_v41 = vpack.c.bf16 %v878_v40, %v878_v40 }
 0x2dc   :  { %1369 = vmatmul.mubr.msk.bf16.vlgmr.msra.gmra.mrb[12].mxu1 %vm763_vm1, %v879_v41  ;;  %1370 = vmatmul.mubr.msk.bf16.vlgmr.msra.gmra.mrb[12].mxu0 %vm763_vm1, %v879_v41 }
 0x2dd   :  { %1152 = vmatpush1.bf16.msra.mxu1 %v1349_v23  ;;  %1193 = vmatpush1.bf16.msra.mxu0 %v1351_v27  ;;  %v928_v23 = vsub.s32 5, %v907_v55 }
 0x2de   :  { %1153 = vmatprep.subr.bf16.mxu1 %v1358_v42  ;;  %1194 = vmatprep.subr.bf16.mxu0 %v1360_v43 }
 0x2df   :  { %1183 = vmatprep.mubr.bf16.mxu1 %v1585_v26  ;;  %1224 = vmatprep.mubr.bf16.mxu0 %v1585_v26  ;;  %v933_v26 = vrot.slane %v904_v58, %v932_v20  ;;  %v929_v27 = vrot.slane %v904_v58, %v928_v23 }
 0x2e1   :  { %1154 = vmatpush1.bf16.msra.mxu1 %v1357_v48  ;;  %1195 = vmatpush1.bf16.msra.mxu0 %v1359_v49 }
 0x2e2   :  { %1155 = vmatprep.subr.bf16.mxu1 %v1366_v50  ;;  %1196 = vmatprep.subr.bf16.mxu0 %v1368_v51 }
 0x2e5   :  { %1156 = vmatpush1.bf16.msra.mxu1 %v1365_v52  ;;  %1197 = vmatpush1.bf16.msra.mxu0 %v1367_v53 }
 0x2e8   :  { %1371 = vmatmul.mubr.msk.bf16.vlgmr.msra.gmra.mrb[16].mxu1 %vm763_vm1, %v879_v41  ;;  %1372 = vmatmul.mubr.msk.bf16.vlgmr.msra.gmra.mrb[16].mxu0 %vm763_vm1, %v879_v41 }
 0x3af   :  { %v1103_v1 = vpop.f32.mrb[12].mxu1  ;;  %v1144_v2 = vpop.f32.mrb[12].mxu0 }
 0x3b0   :  { %v1104_v3 = vadd.f32 %v1103_v1, %v909_v61  ;;  %v1145_v4 = vadd.f32 %v1144_v2, %v917_v62  ;;  %v1105_v5 = vpop.f32.mrb[13].mxu1  ;;  %v1146_v6 = vpop.f32.mrb[13].mxu0 }
 0x3b1   :  { %v1106_v7 = vadd.f32 %v1105_v5, %v913_v63  ;;  %v1147_v8 = vadd.f32 %v1146_v6, %v921_v0  ;;  %v1107_v9 = vpop.f32.mrb[14].mxu1  ;;  %v1148_v10 = vpop.f32.mrb[14].mxu0 }
 0x3b2   :  { %v1233_v11 = vmul.f32 0.01, %v1104_v3  ;;  %v1235_v12 = vmul.f32 0.01, %v1145_v4  ;;  %v1108_v13 = vpop.f32.mrb[15].mxu1  ;;  %v1149_v14 = vpop.f32.mrb[15].mxu0 }
 0x3b3   :  { %v1234_v15 = vmul.f32 0.01, %v1106_v7  ;;  %v1236_v16 = vmul.f32 0.01, %v1147_v8 }
 0x3b4   :  { %v1241_v17 = vmax.f32 %v1104_v3, %v1233_v11  ;;  %v1243_v18 = vmax.f32 %v1145_v4, %v1235_v12 }
 0x3b5   :  { %v1242_v21 = vmax.f32 %v1106_v7, %v1234_v15  ;;  %v1244_v22 = vmax.f32 %v1147_v8, %v1236_v16 }
 0x3b6   :  { %1249 = vst [vmem:[#allocation2] sm:$0xff] %v1241_v17  ;;  %1251 = vst [vmem:[#allocation2 + $0x10] sm:$0xff] %v1243_v18 }
 0x3b7   :  { %1250 = vst [vmem:[#allocation2 + $0x8] sm:$0xff] %v1242_v21  ;;  %1252 = vst [vmem:[#allocation2 + $0x18] sm:$0xff] %v1244_v22 }
 0x3bb   :  { %v1185_v29 = vpop.f32.mrb[16].mxu1  ;;  %v1226_v30 = vpop.f32.mrb[16].mxu0 }
 0x3bc   :  { %v1186_v31 = vadd.f32 %v1185_v29, %v925_v25  ;;  %v1227_v32 = vadd.f32 %v1226_v30, %v933_v26  ;;  %v1187_v33 = vpop.f32.mrb[17].mxu1  ;;  %v1228_v34 = vpop.f32.mrb[17].mxu0 }
 0x3bd   :  { %v1188_v35 = vadd.f32 %v1187_v33, %v929_v27  ;;  %v1229_v36 = vadd.f32 %v1228_v34, %v937_v28  ;;  %v1189_v37 = vpop.f32.mrb[18].mxu1  ;;  %v1230_v38 = vpop.f32.mrb[18].mxu0 }
 0x3be   :  { %v1237_v39 = vmul.f32 0.01, %v1186_v31  ;;  %v1239_v40 = vmul.f32 0.01, %v1227_v32  ;;  %v1190_v41 = vpop.f32.mrb[19].mxu1  ;;  %v1231_v42 = vpop.f32.mrb[19].mxu0 }
 0x3bf   :  { %v1238_v43 = vmul.f32 0.01, %v1188_v35  ;;  %v1240_v44 = vmul.f32 0.01, %v1229_v36 }
 0x3c0   :  { %v1245_v45 = vmax.f32 %v1186_v31, %v1237_v39  ;;  %v1247_v46 = vmax.f32 %v1227_v32, %v1239_v40 }
 0x3c1   :  { %v1246_v47 = vmax.f32 %v1188_v35, %v1238_v43  ;;  %v1248_v48 = vmax.f32 %v1229_v36, %v1240_v44 }
 0x3c2   :  { %1253 = vst [vmem:[#allocation2 + $0x20] sm:$0xff] %v1245_v45  ;;  %1255 = vst [vmem:[#allocation2 + $0x30] sm:$0xff] %v1247_v46 }
 0x3c3   :  { %1254 = vst [vmem:[#allocation2 + $0x28] sm:$0xff] %v1246_v47  ;;  %1256 = vst [vmem:[#allocation2 + $0x38] sm:$0xff] %v1248_v48 }
 0x3c4   :  { %1570 = shalt.err (!%p1567_p4)
}
 0x3c5   :  { %s1571_s16 = scalar_lea.hbm %s1978_s9, 1024 }
 0x3c6   :  { %p1572_p5 = scmp.ne.s32.totalorder %s1978_s9, %s1571_s16  ;;  %p1575_p6 = scmp.lt.u32.totalorder %s1571_s16, %s1978_s9 }
 0x3c8   :  { %p1577_p7 = pnand %p1575_p6, %p1572_p5 }
 0x3ca   :  { %1580 = shalt.err (!%p1577_p7)
}
 0x3cb   :  { %1266 = dma.vmem_to_hbm [thread:$0]  %s1264_s12, 1024, %s1978_s9, [#allocation3]  }
 0x3cc   :  { %1581 = dma.done.wait [#allocation3], 1024  }
 0x3cd   :  { %1582 = vsyncadd [#allocation3], 4294966272 }
 0x3ce   :  { %1270 = vsyncpa [#allocation3], 1 }

</bundles_post_ra>
